<compile_context>
chip_gen: v5e
topology: v5e:2x2
jax: 0.10.0
libtpu: 0.0.40
codegen_flags: <defaults>
</compile_context>

<pallas_src>
import functools

import jax
import jax.numpy as jnp
from jax.experimental import pallas as pl
from jax.experimental.pallas import tpu as pltpu


def find_multiple(n: int, k: int) -> int:
    if n % k == 0:
        return n
    return n + k - n % k


# ---------------------------------------------------------------------------
# Chip introspection (safe fallbacks if not available)
# ---------------------------------------------------------------------------
def _tpu_generation() -> str:
    try:
        kind = jax.devices()[0].device_kind.lower()
    except Exception:
        kind = ""
    if "v7" in kind or "7x" in kind:
        return "v7x"
    if "v6" in kind:
        return "v6e"
    if "v5" in kind:
        return "v5e"
    return "unknown"


def _vmem_ceiling_bytes(gen: str) -> int:
    try:
        cap = int(pltpu.get_tpu_info().vmem_capacity_bytes)
    except Exception:
        cap = (64 << 20) if gen == "v7x" else (128 << 20)
    if cap >= (128 << 20):
        return 100 << 20          # v5e / v6e: use most of the 128 MiB
    if cap >= (64 << 20):
        return 56 << 20           # v7x: 64 MiB physical
    return int(cap * 3 // 4)


# ---------------------------------------------------------------------------
# Kernel
# ---------------------------------------------------------------------------
def ffn_kernel(x_ref, w13_ref, w2_ref, o_ref, *scratch,
               th, compute_dtype, gate_dtype, num_k):
    """One (token-tile, hidden-block) grid step.

    x_ref   : (tm, D)      activation tile (native dtype; cast in-kernel)
    w13_ref : (D, 2*th)    fused [w1_blk | w3_blk] up-projection block
    w2_ref  : (th, D)      down-projection block
    o_ref   : (tm, D)      output tile
    scratch : ()           if num_k == 1, else ((tm, D) f32 accumulator,)
    """
    x = x_ref[...]
    if x.dtype != jnp.dtype(compute_dtype):
        x = x.astype(compute_dtype)           # VPU cast, hidden under weight DMA

    # Fused up-projection: one MXU matmul produces both W1 and W3 halves.
    h = jnp.dot(x, w13_ref[...], preferred_element_type=jnp.float32)  # (tm, 2*th)
    h1 = h[:, :th]      # th is a multiple of 128 -> lane-aligned free view
    h3 = h[:, th:]
    if jnp.dtype(gate_dtype) != jnp.dtype(jnp.float32):
        h1 = h1.astype(gate_dtype)
        h3 = h3.astype(gate_dtype)
    g = (h1 * jax.nn.sigmoid(h1)) * h3

    p = jnp.dot(g.astype(w2_ref.dtype), w2_ref[...],
                preferred_element_type=jnp.float32)                   # (tm, D) f32

    if num_k == 1:
        # Single hidden block: no accumulator round trip at all.
        o_ref[...] = p.astype(o_ref.dtype)
    else:
        acc_ref, = scratch
        k = pl.program_id(1)

        @pl.when(k == 0)
        def _first():
            acc_ref[...] = p                 # direct write, no zero-init pass

        @pl.when(k > 0)
        def _accum():
            acc_ref[...] += p

        @pl.when(k == num_k - 1)
        def _finalize():
            o_ref[...] = acc_ref[...].astype(o_ref.dtype)


# ---------------------------------------------------------------------------
# Tiling choices
# ---------------------------------------------------------------------------
def _choose_th(H, th, gen):
    """Pick the hidden block size (always a multiple of 128) and padded H."""
    target = 256 if gen == "v7x" else 512
    H128 = find_multiple(H, 128)
    if th is None:
        th = target
    th = max(128, find_multiple(th, 128))
    if th >= H128:
        return H128, H128                    # single block, still 128-aligned
    # Prefer an exact divisor of H128 (avoids zero-padded hidden blocks).
    cand = th
    while cand >= max(128, th // 2):
        if H128 % cand == 0:
            return cand, H128
        cand -= 128
    return th, find_multiple(H128, th)


def _choose_tm(T, tm, gen):
    if tm is None:
        tm = 512 if gen == "v7x" else 1024   # v6e breakeven ~650 rows; v7x ~310-400
    if tm >= T:
        tm = find_multiple(T, 16)            # single token tile, sublane-aligned
    elif tm >= 256:
        tm = find_multiple(tm, 256)
    else:
        tm = find_multiple(tm, 16)
    T_pad = find_multiple(T, tm)
    # v7x has 2 TensorCores: make sure the parallel axis has >= 2 tiles when
    # there is enough work.
    if gen == "v7x" and T_pad // tm < 2 and T >= 32:
        tm = find_multiple((T + 1) // 2, 16)
        T_pad = 2 * tm
    return tm, T_pad


# ---------------------------------------------------------------------------
# Weight preparation (do ONCE at parameter init, not per forward call)
# ---------------------------------------------------------------------------
def prepare_ffn_weights(w1, w2, w3, *, th=None, compute_dtype=None):
    """w1, w3: (H, D); w2: (D, H)  (PyTorch nn.Linear layout).

    Returns (w13t, w2t, th):
      w13t : (D, 2*H_pad) block-interleaved [w1_blk_k | w3_blk_k] per hidden block
      w2t  : (H_pad, D)
    Zero-padding of H is numerically inert (silu(0)*0 == 0).
    """
    H, D = w1.shape
    gen = _tpu_generation()
    th, H_pad = _choose_th(H, th, gen)
    cdt = compute_dtype if compute_dtype is not None else w1.dtype

    w1t = w1.T.astype(cdt)   # (D, H)
    w3t = w3.T.astype(cdt)   # (D, H)
    w2t = w2.T.astype(cdt)   # (H, D)
    if H_pad > H:
        w1t = jnp.pad(w1t, ((0, 0), (0, H_pad - H)))
        w3t = jnp.pad(w3t, ((0, 0), (0, H_pad - H)))
        w2t = jnp.pad(w2t, ((0, H_pad - H), (0, 0)))

    kH = H_pad // th
    w13t = jnp.concatenate(
        [w1t.reshape(D, kH, th), w3t.reshape(D, kH, th)], axis=2
    ).reshape(D, 2 * H_pad)
    return w13t, w2t, th


# ---------------------------------------------------------------------------
# Wrapper
# ---------------------------------------------------------------------------
def feed_forward(x, w13t, w2t, *, th, tm=None, interpret=False):
    """x: (B, S, D). w13t/w2t/th from prepare_ffn_weights()."""
    B, S, D = x.shape
    out_dtype = x.dtype
    cdt = w13t.dtype
    assert w13t.shape[0] == D
    H_pad = w13t.shape[1] // 2
    assert H_pad % th == 0
    kH = H_pad // th

    gen = _tpu_generation()
    vmem_ceiling = _vmem_ceiling_bytes(gen)

    T = B * S
    tm, T_pad = _choose_tm(T, tm, gen)

    xbytes = jnp.dtype(x.dtype).itemsize
    wbytes = jnp.dtype(cdt).itemsize
    obytes = jnp.dtype(out_dtype).itemsize

    # bf16 gating only where the VALU/EUP have a bf16 path (v6e/v7x).
    gate_dtype = (jnp.bfloat16
                  if (jnp.dtype(cdt) == jnp.dtype(jnp.bfloat16)
                      and gen in ("v6e", "v7x"))
                  else jnp.float32)
    gbytes = jnp.dtype(gate_dtype).itemsize

    def est_fn(tm_):
        e = 2 * (D * 2 * th + th * D) * wbytes   # double-buffered weight streams
        e += 2 * tm_ * D * xbytes                # x tiles (native dtype, x2 bufs)
        e += 2 * tm_ * D * obytes                # output tiles (x2 bufs)
        if kH > 1:
            e += tm_ * D * 4                     # f32 accumulator scratch
        e += tm_ * 2 * th * 4                    # up-projection intermediate (f32)
        e += tm_ * 2 * th * gbytes               # gated intermediate
        return e

    # Shrink the token tile until the footprint fits the per-chip VMEM ceiling
    # (instead of clipping vmem_limit below the real requirement).
    while int(est_fn(tm) * 1.2) > vmem_ceiling and tm > 16:
        tm = max(16, (tm // 2) // 16 * 16)
        T_pad = find_multiple(T, tm)
    est = est_fn(tm)
    vmem_limit = int(min(vmem_ceiling, max(32 << 20, int(est * 1.25))))

    x2d = x.reshape(T, D)                        # native dtype; cast in-kernel
    if T_pad > T:
        x2d = jnp.pad(x2d, ((0, T_pad - T), (0, 0)))

    n_tok_tiles = T_pad // tm
    cost = pl.CostEstimate(
        flops=6 * T_pad * D * H_pad,
        transcendentals=T_pad * H_pad,
        bytes_accessed=(T_pad * D * xbytes + T_pad * D * obytes
                        + n_tok_tiles * (w13t.size * wbytes + w2t.size * wbytes)),
    )

    kernel = functools.partial(ffn_kernel, th=th, compute_dtype=cdt,
                               gate_dtype=gate_dtype, num_k=kH)

    out2d = pl.pallas_call(
        kernel,
        out_shape=jax.ShapeDtypeStruct((T_pad, D), out_dtype),
        grid_spec=pltpu.PrefetchScalarGridSpec(
            num_scalar_prefetch=0,
            grid=(n_tok_tiles, kH),
            in_specs=[
                pl.BlockSpec((tm, D), lambda i, k: (i, 0)),       # x tile
                pl.BlockSpec((D, 2 * th), lambda i, k: (0, k)),   # fused W1|W3 block
                pl.BlockSpec((th, D), lambda i, k: (k, 0)),       # W2 block
            ],
            out_specs=pl.BlockSpec((tm, D), lambda i, k: (i, 0)),
            scratch_shapes=([pltpu.VMEM((tm, D), jnp.float32)] if kH > 1 else []),
        ),
        compiler_params=pltpu.CompilerParams(
            dimension_semantics=("parallel", "arbitrary"),
            vmem_limit_bytes=vmem_limit,
        ),
        cost_estimate=cost,
        interpret=interpret,
    )(x2d, w13t, w2t)

    if T_pad > T:
        out2d = out2d[:T]
    return out2d.reshape(B, S, D)


# ---------------------------------------------------------------------------
# Pure-JAX reference
# ---------------------------------------------------------------------------
def reference(x, w1, w2, w3):
    h1 = jnp.einsum("bsd,hd->bsh", x, w1)
    h3 = jnp.einsum("bsd,hd->bsh", x, w3)
    g = jax.nn.silu(h1) * h3
    return jnp.einsum("bsh,dh->bsd", g, w2)


if __name__ == "__main__":
    # ModelArgs-consistent small shapes:
    #   dim=64, multiple_of=32 -> hidden_dim = find_multiple(int(2*4*64/3), 32) = 192
    B, S, dim = 2, 8, 64
    multiple_of = 32
    hidden_dim = find_multiple(int(2 * (4 * dim) / 3), multiple_of)  # 192

    key = jax.random.PRNGKey(0)
    kx, k1, k2, k3 = jax.random.split(key, 4)
    x = jax.random.normal(kx, (B, S, dim), dtype=jnp.float32)
    # nn.Linear(in, out) weight shape is (out, in)
    w1 = jax.random.normal(k1, (hidden_dim, dim), dtype=jnp.float32) * 0.05
    w2 = jax.random.normal(k2, (dim, hidden_dim), dtype=jnp.float32) * 0.05
    w3 = jax.random.normal(k3, (hidden_dim, dim), dtype=jnp.float32) * 0.05

    ref = reference(x, w1, w2, w3)

    # 1) f32 path, single fused hidden block (128-aligned, H padded 192->256).
    w13t, w2t, th = prepare_ffn_weights(w1, w2, w3, compute_dtype=jnp.float32)
    out = jax.block_until_ready(feed_forward(x, w13t, w2t, th=th))
    assert out.shape == (B, S, dim)
    assert jnp.allclose(out, ref, atol=1e-4, rtol=1e-4)

    # 2) Streamed hidden blocks (th=128 -> 2 reduction steps, accumulator path)
    #    plus multiple token tiles with token padding (T=40, tm=16 -> T_pad=48).
    B2, S2 = 2, 20
    x2 = jax.random.normal(kx, (B2, S2, dim), dtype=jnp.float32)
    ref2 = reference(x2, w1, w2, w3)
    w13t_s, w2t_s, th_s = prepare_ffn_weights(
        w1, w2, w3, th=128, compute_dtype=jnp.float32)
    out2 = jax.block_until_ready(feed_forward(x2, w13t_s, w2t_s, th=th_s, tm=16))
    assert out2.shape == (B2, S2, dim)
    assert jnp.allclose(out2, ref2, atol=1e-4, rtol=1e-4)

    # 3) bf16 MXU path (f32 accumulation; bf16 gating on v6e/v7x, f32 on v5e),
    #    f32 activations cast to bf16 inside the kernel.
    w13t_b, w2t_b, th_b = prepare_ffn_weights(
        w1, w2, w3, compute_dtype=jnp.bfloat16)
    out3 = jax.block_until_ready(feed_forward(x, w13t_b, w2t_b, th=th_b))
    assert out3.shape == (B, S, dim)
    assert jnp.allclose(out3.astype(jnp.float32), ref, atol=3e-2, rtol=3e-2)

    print("KERNEL_OK")
</pallas_src>

<mosaic_0001>
module attributes {stable_mosaic.version = 11 : i64} {
  func.func @ffn_kernel(%arg0: i32, %arg1: i32, %arg2: memref<16x64xf32, #tpu.memory_space<vmem>>, %arg3: memref<64x512xf32, #tpu.memory_space<vmem>>, %arg4: memref<256x64xf32, #tpu.memory_space<vmem>>, %arg5: memref<16x64xf32, #tpu.memory_space<vmem>>) attributes {dimension_semantics = [#tpu.dimension_semantics<parallel>, #tpu.dimension_semantics<arbitrary>], iteration_bounds = array<i64: 1, 1>, scalar_prefetch = 0 : i64, scratch_operands = 0 : i64, tpu.core_type = #tpu.core_type<tc>, window_params = [{transform_indices = @transform_0, window_bounds = array<i64: 16, 64>}, {transform_indices = @transform_1, window_bounds = array<i64: 64, 512>}, {transform_indices = @transform_2, window_bounds = array<i64: 256, 64>}, {transform_indices = @transform_3, window_bounds = array<i64: 16, 64>}]} {
    %c0 = arith.constant 0 : index
    %c0_0 = arith.constant 0 : index
    %0 = vector.load %arg2[%c0, %c0_0] : memref<16x64xf32, #tpu.memory_space<vmem>>, vector<16x64xf32>
    %c0_1 = arith.constant 0 : index
    %c0_2 = arith.constant 0 : index
    %1 = vector.load %arg3[%c0_1, %c0_2] : memref<64x512xf32, #tpu.memory_space<vmem>>, vector<64x512xf32>
    %cst = arith.constant dense<0.000000e+00> : vector<16x512xf32>
    %2 = tpu.matmul %0, %1, %cst {dimension_numbers = #tpu.dot_dimension_numbers<[1], [0], [0], [1], [0, 0, 1, 1], [], []>} : vector<16x64xf32>, vector<64x512xf32>, vector<16x512xf32> -> vector<16x512xf32>
    %3 = vector.extract_strided_slice %2 {offsets = [0, 0], sizes = [16, 256], strides = [1, 1]} : vector<16x512xf32> to vector<16x256xf32>
    %4 = vector.extract_strided_slice %2 {offsets = [0, 256], sizes = [16, 256], strides = [1, 1]} : vector<16x512xf32> to vector<16x256xf32>
    %5 = arith.negf %3 : vector<16x256xf32>
    %6 = math.exp %5 : vector<16x256xf32>
    %cst_3 = arith.constant 1.000000e+00 : f32
    %7 = vector.broadcast %cst_3 : f32 to vector<16x256xf32>
    %8 = arith.addf %7, %6 : vector<16x256xf32>
    %9 = arith.divf %7, %8 : vector<16x256xf32>
    %10 = arith.mulf %3, %9 : vector<16x256xf32>
    %11 = arith.mulf %10, %4 : vector<16x256xf32>
    %c0_4 = arith.constant 0 : index
    %c0_5 = arith.constant 0 : index
    %12 = vector.load %arg4[%c0_4, %c0_5] : memref<256x64xf32, #tpu.memory_space<vmem>>, vector<256x64xf32>
    %cst_6 = arith.constant dense<0.000000e+00> : vector<16x64xf32>
    %13 = tpu.matmul %11, %12, %cst_6 {dimension_numbers = #tpu.dot_dimension_numbers<[1], [0], [0], [1], [0, 0, 1, 1], [], []>} : vector<16x256xf32>, vector<256x64xf32>, vector<16x64xf32> -> vector<16x64xf32>
    %c0_7 = arith.constant 0 : index
    %c0_8 = arith.constant 0 : index
    %14 = vector.load %arg5[%c0_7, %c0_8] : memref<16x64xf32, #tpu.memory_space<vmem>>, vector<16x64xf32>
    tpu.vector_store %arg5[%c0_7, %c0_8], %13 {strides = array<i32>} : memref<16x64xf32, #tpu.memory_space<vmem>>, vector<16x64xf32>,
    return
  }
  func.func @transform_0(%arg0: i32, %arg1: i32) -> (i32, i32) {
    %c0_i32 = arith.constant 0 : i32
    %c0_i32_0 = arith.constant 0 : i32
    return %arg0, %c0_i32 : i32, i32
  }
  func.func @transform_1(%arg0: i32, %arg1: i32) -> (i32, i32) {
    %c0_i32 = arith.constant 0 : i32
    %c0_i32_0 = arith.constant 0 : i32
    return %c0_i32, %arg1 : i32, i32
  }
  func.func @transform_2(%arg0: i32, %arg1: i32) -> (i32, i32) {
    %c0_i32 = arith.constant 0 : i32
    %c0_i32_0 = arith.constant 0 : i32
    return %arg1, %c0_i32 : i32, i32
  }
  func.func @transform_3(%arg0: i32, %arg1: i32) -> (i32, i32) {
    %c0_i32 = arith.constant 0 : i32
    %c0_i32_0 = arith.constant 0 : i32
    return %arg0, %c0_i32 : i32, i32
  }
}

</mosaic_0001>

<bundles_post_ra>
// kernel: tpu_custom_call.1
= control target key start
LH: loop header
LB: loop body
LE: loop exit
PB: predicated region body
PF: predicated region fallthrough
CT: control target
= control target key end

     0   :  { %s637_s0 = inlined_call_operand.vmem [shape: f32[16,64], index: 0, kind: input, shape index: {}]   ;;  %s638_s1 = inlined_call_operand.vmem [shape: f32[64,512], index: 1, kind: input, shape index: {}]   ;;  %s639_s2 = inlined_call_operand.vmem [shape: f32[256,64], index: 2, kind: input, shape index: {}]   ;;  %s640_s3 = inlined_call_operand.hbm [shape: f32[16,64], index: 3, kind: output, shape index: {}]  }
   0x1   :  { %v45_v0 = vld [vmem:[%s638_s1 + $0xe0] sm:$0xff]  ;;  %v46_v1 = vld [vmem:[%s638_s1 + $0xe8] sm:$0xff] }
   0x2   :  { %v41_v2 = vld [vmem:[%s638_s1 + $0xc0] sm:$0xff]  ;;  %64 = vmatpush.msra.mxu2 %v45_v0  ;;  %87 = vmatpush.msra.mxu3 %v46_v1  ;;  %v42_v3 = vld [vmem:[%s638_s1 + $0xc8] sm:$0xff] }
   0x3   :  { %v37_v4 = vld [vmem:[%s638_s1 + $0xa0] sm:$0xff]  ;;  %v38_v5 = vld [vmem:[%s638_s1 + $0xa8] sm:$0xff] }
   0x4   :  { %65 = vmatpush.msra.mxu2 %v41_v2  ;;  %88 = vmatpush.msra.mxu3 %v42_v3  ;;  %v33_v6 = vld [vmem:[%s638_s1 + $0x80] sm:$0xff]  ;;  %v34_v7 = vld [vmem:[%s638_s1 + $0x88] sm:$0xff] }
   0x5   :  { %v29_v8 = vld [vmem:[%s638_s1 + $0x60] sm:$0xff]  ;;  %v30_v9 = vld [vmem:[%s638_s1 + $0x68] sm:$0xff] }
   0x6   :  { %66 = vmatpush.msra.mxu2 %v37_v4  ;;  %89 = vmatpush.msra.mxu3 %v38_v5  ;;  %v25_v10 = vld [vmem:[%s638_s1 + $0x40] sm:$0xff]  ;;  %v26_v11 = vld [vmem:[%s638_s1 + $0x48] sm:$0xff] }
   0x7   :  { %v21_v12 = vld [vmem:[%s638_s1 + $0x20] sm:$0xff]  ;;  %v22_v13 = vld [vmem:[%s638_s1 + $0x28] sm:$0xff] }
   0x8   :  { %67 = vmatpush.msra.mxu2 %v33_v6  ;;  %90 = vmatpush.msra.mxu3 %v34_v7 }
   0xa   :  { %68 = vmatpush.msra.mxu2 %v29_v8  ;;  %91 = vmatpush.msra.mxu3 %v30_v9 }
   0xc   :  { %69 = vmatpush.msra.mxu2 %v25_v10  ;;  %92 = vmatpush.msra.mxu3 %v26_v11 }
   0xd   :  { %8 = vsyncpa [#allocation3], 0  ;;  %v17_v14 = vld [vmem:[%s638_s1] sm:$0xff]  ;;  %v18_v15 = vld [vmem:[%s638_s1 + $0x8] sm:$0xff]  ;;  %vm49_vm0 = vcmask 523264   ;;  %s318_s6 = sshll.u32 %s640_s3, 4  ;;  %s319_s6 = int_to_ptr.hbm [resolvable:$true] %s318_s6 }
   0xe   :  { %70 = vmatpush.msra.mxu2 %v21_v12  ;;  %93 = vmatpush.msra.mxu3 %v22_v13  ;;  %v15_v16 = vld [vmem:[%s637_s0] sm:$0xff]  ;;  %v47_v17 = vld [vmem:[%s638_s1 + $0xf0] sm:$0xff]  ;;  %v48_v18 = vld [vmem:[%s638_s1 + $0xf8] sm:$0xff]  ;;  %s388_s7 = smov 128   ;;  %s389_s8 = smov 8  }
   0xf   :  { %v43_v19 = vld [vmem:[%s638_s1 + $0xd0] sm:$0xff]  ;;  %v44_v20 = vld [vmem:[%s638_s1 + $0xd8] sm:$0xff]  ;;  %v16_v25 = vld [vmem:[%s637_s0 + $0x8] sm:$0xff] }
  0x10   :  { %71 = vmatpush.msra.mxu2 %v17_v14  ;;  %94 = vmatpush.msra.mxu3 %v18_v15  ;;  %v39_v21 = vld [vmem:[%s638_s1 + $0xb0] sm:$0xff]  ;;  %v40_v22 = vld [vmem:[%s638_s1 + $0xb8] sm:$0xff]  ;;  %v245_v38 = vld [vmem:[%s639_s2 + $0x68] sm:$0xff] }
  0x11   :  { %330 = vmatmul.msk.f32.vlgmr.msra.gmra.mxu2 %vm49_vm0, %v15_v16  ;;  %332 = vmatmul.msk.f32.vlgmr.msra.gmra.mxu3 %vm49_vm0, %v15_v16  ;;  %v35_v23 = vld [vmem:[%s638_s1 + $0x90] sm:$0xff]  ;;  %v36_v24 = vld [vmem:[%s638_s1 + $0x98] sm:$0xff]  ;;  %v261_v39 = vld [vmem:[%s639_s2 + $0xe8] sm:$0xff] }
  0x12   :  { %110 = vmatpush.msrb.mxu2 %v47_v17  ;;  %133 = vmatpush.msrb.mxu3 %v48_v18  ;;  %v31_v26 = vld [vmem:[%s638_s1 + $0x70] sm:$0xff]  ;;  %v32_v27 = vld [vmem:[%s638_s1 + $0x78] sm:$0xff]  ;;  %v244_v40 = vld [vmem:[%s639_s2 + $0x60] sm:$0xff] }
  0x13   :  { %v27_v28 = vld [vmem:[%s638_s1 + $0x50] sm:$0xff]  ;;  %v28_v29 = vld [vmem:[%s638_s1 + $0x58] sm:$0xff]  ;;  %v260_v41 = vld [vmem:[%s639_s2 + $0xe0] sm:$0xff] }
  0x14   :  { %111 = vmatpush.msrb.mxu2 %v43_v19  ;;  %134 = vmatpush.msrb.mxu3 %v44_v20  ;;  %v23_v30 = vld [vmem:[%s638_s1 + $0x30] sm:$0xff]  ;;  %v24_v31 = vld [vmem:[%s638_s1 + $0x38] sm:$0xff]  ;;  %v241_v46 = vld [vmem:[%s639_s2 + $0x48] sm:$0xff] }
  0x15   :  { %v19_v32 = vld [vmem:[%s638_s1 + $0x10] sm:$0xff]  ;;  %v20_v33 = vld [vmem:[%s638_s1 + $0x18] sm:$0xff]  ;;  %v257_v47 = vld [vmem:[%s639_s2 + $0xc8] sm:$0xff] }
  0x16   :  { %112 = vmatpush.msrb.mxu2 %v39_v21  ;;  %135 = vmatpush.msrb.mxu3 %v40_v22  ;;  %v247_v34 = vld [vmem:[%s639_s2 + $0x78] sm:$0xff]  ;;  %v246_v36 = vld [vmem:[%s639_s2 + $0x70] sm:$0xff]  ;;  %v240_v48 = vld [vmem:[%s639_s2 + $0x40] sm:$0xff] }
  0x17   :  { %v263_v35 = vld [vmem:[%s639_s2 + $0xf8] sm:$0xff]  ;;  %264 = vmatpush.msra.mxu0 %v247_v34  ;;  %v262_v37 = vld [vmem:[%s639_s2 + $0xf0] sm:$0xff]  ;;  %v256_v49 = vld [vmem:[%s639_s2 + $0xc0] sm:$0xff] }
  0x18   :  { %113 = vmatpush.msrb.mxu2 %v35_v23  ;;  %136 = vmatpush.msrb.mxu3 %v36_v24  ;;  %v243_v42 = vld [vmem:[%s639_s2 + $0x58] sm:$0xff]  ;;  %v242_v44 = vld [vmem:[%s639_s2 + $0x50] sm:$0xff]  ;;  %v237_v54 = vld [vmem:[%s639_s2 + $0x28] sm:$0xff] }
  0x19   :  { %331 = vmatmul.msk.f32.gmra.mxu2 %vm49_vm0, %v16_v25  ;;  %333 = vmatmul.msk.f32.gmra.mxu3 %vm49_vm0, %v16_v25  ;;  %v259_v43 = vld [vmem:[%s639_s2 + $0xd8] sm:$0xff]  ;;  %v258_v45 = vld [vmem:[%s639_s2 + $0xd0] sm:$0xff]  ;;  %v253_v55 = vld [vmem:[%s639_s2 + $0xa8] sm:$0xff] }
  0x1a   :  { %114 = vmatpush.msrb.mxu2 %v31_v26  ;;  %137 = vmatpush.msrb.mxu3 %v32_v27  ;;  %v239_v50 = vld [vmem:[%s639_s2 + $0x38] sm:$0xff]  ;;  %v238_v52 = vld [vmem:[%s639_s2 + $0x30] sm:$0xff]  ;;  %v236_v56 = vld [vmem:[%s639_s2 + $0x20] sm:$0xff] }
  0x1b   :  { %287 = vmatpush.msra.mxu1 %v263_v35  ;;  %265 = vmatpush.msra.mxu0 %v246_v36  ;;  %v255_v51 = vld [vmem:[%s639_s2 + $0xb8] sm:$0xff]  ;;  %v254_v53 = vld [vmem:[%s639_s2 + $0xb0] sm:$0xff]  ;;  %v252_v57 = vld [vmem:[%s639_s2 + $0xa0] sm:$0xff] }
  0x1c   :  { %115 = vmatpush.msrb.mxu2 %v27_v28  ;;  %138 = vmatpush.msrb.mxu3 %v28_v29  ;;  %v235_v58 = vld [vmem:[%s639_s2 + $0x18] sm:$0xff]  ;;  %v234_v60 = vld [vmem:[%s639_s2 + $0x10] sm:$0xff]  ;;  %v233_v2 = vld [vmem:[%s639_s2 + $0x8] sm:$0xff] }
  0x1d   :  { %288 = vmatpush.msra.mxu1 %v262_v37  ;;  %266 = vmatpush.msra.mxu0 %v245_v38  ;;  %v251_v59 = vld [vmem:[%s639_s2 + $0x98] sm:$0xff]  ;;  %v250_v61 = vld [vmem:[%s639_s2 + $0x90] sm:$0xff]  ;;  %v249_v3 = vld [vmem:[%s639_s2 + $0x88] sm:$0xff] }
  0x1e   :  { %116 = vmatpush.msrb.mxu2 %v23_v30  ;;  %139 = vmatpush.msrb.mxu3 %v24_v31  ;;  %v232_v4 = vld [vmem:[%s639_s2] sm:$0xff] }
  0x1f   :  { %289 = vmatpush.msra.mxu1 %v261_v39  ;;  %267 = vmatpush.msra.mxu0 %v244_v40  ;;  %v248_v5 = vld [vmem:[%s639_s2 + $0x80] sm:$0xff]  ;;  %s387_s2 = smov [#allocation2]  }
  0x20   :  { %117 = vmatpush.msrb.mxu2 %v19_v32  ;;  %140 = vmatpush.msrb.mxu3 %v20_v33  ;;  %s316_s30 = sshll.u32 %s387_s2, 4  ;;  %s317_s30 = int_to_ptr.vmem [resolvable:$true] %s316_s30 }
  0x21   :  { %334 = vmatmul.msk.f32.vlgmr.msrb.gmra.mxu2 %vm49_vm0, %v15_v16  ;;  %336 = vmatmul.msk.f32.vlgmr.msrb.gmra.mxu3 %vm49_vm0, %v15_v16 }
  0x22   :  { %290 = vmatpush.msra.mxu1 %v260_v41  ;;  %268 = vmatpush.msra.mxu0 %v243_v42 }
  0x24   :  { %291 = vmatpush.msra.mxu1 %v259_v43  ;;  %269 = vmatpush.msra.mxu0 %v242_v44 }
  0x26   :  { %292 = vmatpush.msra.mxu1 %v258_v45  ;;  %270 = vmatpush.msra.mxu0 %v241_v46 }
  0x28   :  { %293 = vmatpush.msra.mxu1 %v257_v47  ;;  %271 = vmatpush.msra.mxu0 %v240_v48 }
  0x29   :  { %335 = vmatmul.msk.f32.gmra.mxu2 %vm49_vm0, %v16_v25  ;;  %337 = vmatmul.msk.f32.gmra.mxu3 %vm49_vm0, %v16_v25 }
  0x2a   :  { %294 = vmatpush.msra.mxu1 %v256_v49  ;;  %272 = vmatpush.msra.mxu0 %v239_v50 }
  0x2c   :  { %295 = vmatpush.msra.mxu1 %v255_v51  ;;  %273 = vmatpush.msra.mxu0 %v238_v52 }
  0x2e   :  { %296 = vmatpush.msra.mxu1 %v254_v53  ;;  %274 = vmatpush.msra.mxu0 %v237_v54 }
  0x30   :  { %297 = vmatpush.msra.mxu1 %v253_v55  ;;  %275 = vmatpush.msra.mxu0 %v236_v56 }
  0x32   :  { %298 = vmatpush.msra.mxu1 %v252_v57  ;;  %276 = vmatpush.msra.mxu0 %v235_v58 }
  0x34   :  { %299 = vmatpush.msra.mxu1 %v251_v59  ;;  %277 = vmatpush.msra.mxu0 %v234_v60 }
  0x36   :  { %300 = vmatpush.msra.mxu1 %v250_v61  ;;  %278 = vmatpush.msra.mxu0 %v233_v2 }
  0x38   :  { %301 = vmatpush.msra.mxu1 %v249_v3  ;;  %279 = vmatpush.msra.mxu0 %v232_v4 }
  0x3a   :  { %302 = vmatpush.msra.mxu1 %v248_v5 }
  0x94   :  { %v604_v62 = vpop.f32.mrf.mxu2  ;;  %v606_v63 = vpop.f32.mrf.mxu3 }
  0x95   :  { %v338_v0 = vmul.f32 -1.442695, %v604_v62  ;;  %v339_v1 = vmul.f32 -1.442695, %v606_v63 }
  0x97   :  { %345 = vpow2.f32 %v338_v0 }
  0x98   :  { %347 = vpow2.f32 %v339_v1 }
  0x9c   :  { %v622_v6 = vpop.f32.mrf.mxu2  ;;  %v624_v7 = vpop.f32.mrf.mxu3 }
  0x9d   :  { %v346_v8 = vpop.eup %345  ;;  %v340_v9 = vmul.f32 -1.442695, %v622_v6  ;;  %v341_v12 = vmul.f32 -1.442695, %v624_v7 }
  0x9e   :  { %v348_v10 = vpop.eup %347  ;;  %v160_v11 = vadd.f32 1.0, %v346_v8 }
  0x9f   :  { %v161_v13 = vadd.f32 1.0, %v348_v10  ;;  %349 = vpow2.f32 %v340_v9 }
  0xa0   :  { %351 = vrcp.f32 %v160_v11  ;;  %v173_v23 = vand.u32 2147483647, %v160_v11  ;;  %v175_v24 = vand.u32 2147483648, %v160_v11  ;;  %vm169_vm3 = vweird.f32 %v160_v11 }
  0xa1   :  { %353 = vrcp.f32 %v161_v13  ;;  %v190_v27 = vand.u32 2147483648, %v161_v13  ;;  %v188_v29 = vand.u32 2147483647, %v161_v13  ;;  %vm184_vm5 = vweird.f32 %v161_v13 }
  0xa2   :  { %355 = vpow2.f32 %v341_v12  ;;  %v176_v32 = vor.u32 1.1754944e-38, %v175_v24  ;;  %vm174_vm6 = vcmp.eq.f32.partialorder %v173_v23, 8.507059e+37 }
  0xa3   :  { %v191_v36 = vor.u32 1.1754944e-38, %v190_v27  ;;  %vm189_vm8 = vcmp.eq.f32.partialorder %v188_v29, 8.507059e+37 }
  0xa4   :  { %v119_v34 = vpop.f32.mrf.mxu2  ;;  %v142_v44 = vpop.f32.mrf.mxu3 }
  0xa5   :  { %v350_v14 = vpop.eup %349 }
  0xa6   :  { %v352_v15 = vpop.eup %351  ;;  %v162_v16 = vadd.f32 1.0, %v350_v14 }
  0xa7   :  { %v354_v17 = vpop.eup %353  ;;  %v165_v18 = vmul.f32 %v352_v15, %v160_v11  ;;  %vm170_vm1 = vweird.f32 %v352_v15 }
  0xa8   :  { %v356_v19 = vpop.eup %355  ;;  %v180_v20 = vmul.f32 %v354_v17, %v161_v13  ;;  %357 = vrcp.f32 %v162_v16  ;;  %vm185_vm2 = vweird.f32 %v354_v17  ;;  %vm171_vm4 = vmor %vm169_vm3, %vm170_vm1  ;;  %v205_v46 = vand.u32 2147483648, %v162_v16 }
  0xa9   :  { %v166_v21 = vsub.f32 1.0, %v165_v18  ;;  %v163_v22 = vadd.f32 1.0, %v356_v19  ;;  %vm186_vm7 = vmor %vm184_vm5, %vm185_vm2  ;;  %v203_v49 = vand.u32 2147483647, %v162_v16  ;;  %vm199_vm10 = vweird.f32 %v162_v16 }
  0xaa   :  { %v181_v25 = vsub.f32 1.0, %v180_v20  ;;  %v206_v55 = vor.u32 1.1754944e-38, %v205_v46 }
  0xab   :  { %v167_v26 = vmul.f32 %v352_v15, %v166_v21  ;;  %359 = vrcp.f32 %v163_v22  ;;  %v220_v54 = vand.u32 2147483648, %v163_v22  ;;  %v218_v57 = vand.u32 2147483647, %v163_v22 }
  0xac   :  { %v182_v28 = vmul.f32 %v354_v17, %v181_v25  ;;  %vm204_vm13 = vcmp.eq.f32.partialorder %v203_v49, 8.507059e+37  ;;  %vm214_vm14 = vweird.f32 %v163_v22  ;;  %v122_v61 = vpop.f32.mrf.mxu2  ;;  %v145_v3 = vpop.f32.mrf.mxu3 }
  0xad   :  { %v168_v30 = vadd.f32 %v352_v15, %v167_v26  ;;  %vm219_vm1 = vcmp.eq.f32.partialorder %v218_v57, 8.507059e+37 }
  0xae   :  { %v358_v31 = vpop.eup %357  ;;  %v183_v33 = vadd.f32 %v354_v17, %v182_v28 }
  0xaf   :  { %v172_v35 = vsel %vm171_vm4, %v352_v15, %v168_v30  ;;  %v195_v37 = vmul.f32 %v358_v31, %v162_v16  ;;  %vm200_vm9 = vweird.f32 %v358_v31 }
  0xb0   :  { %v177_v38 = vsel %vm174_vm6, %v176_v32, %v172_v35  ;;  %v187_v39 = vsel %vm186_vm7, %v354_v17, %v183_v33  ;;  %vm201_vm11 = vmor %vm199_vm10, %vm200_vm9 }
  0xb1   :  { %v360_v40 = vpop.eup %359  ;;  %v224_v41 = vmul.f32 %v177_v38, %v604_v62  ;;  %v192_v42 = vsel %vm189_vm8, %v191_v36, %v187_v39  ;;  %v196_v43 = vsub.f32 1.0, %v195_v37 }
  0xb2   :  { %v225_v45 = vmul.f32 %v192_v42, %v606_v63  ;;  %v210_v47 = vmul.f32 %v360_v40, %v163_v22  ;;  %vm215_vm12 = vweird.f32 %v360_v40  ;;  %v221_v63 = vor.u32 1.1754944e-38, %v220_v54 }
  0xb3   :  { %v197_v48 = vmul.f32 %v358_v31, %v196_v43  ;;  %v228_v50 = vmul.f32 %v224_v41, %v119_v34  ;;  %vm216_vm15 = vmor %vm214_vm14, %vm215_vm12 }
  0xb4   :  { %v211_v51 = vsub.f32 1.0, %v210_v47  ;;  %v229_v52 = vmul.f32 %v225_v45, %v142_v44 }
  0xb5   :  { %v198_v53 = vadd.f32 %v358_v31, %v197_v48  ;;  %280 = vmatmul.f32.vlgmr.msra.gmra.mxu0 %v228_v50 }
  0xb6   :  { %v212_v56 = vmul.f32 %v360_v40, %v211_v51  ;;  %303 = vmatmul.f32.vlgmr.msra.gmra.mxu1 %v229_v52 }
  0xb7   :  { %v202_v58 = vsel %vm201_vm11, %v358_v31, %v198_v53 }
  0xb8   :  { %v207_v59 = vsel %vm204_vm13, %v206_v55, %v202_v58  ;;  %v213_v60 = vadd.f32 %v360_v40, %v212_v56 }
  0xb9   :  { %v226_v62 = vmul.f32 %v207_v59, %v622_v6 }
  0xba   :  { %v217_v0 = vsel %vm216_vm15, %v360_v40, %v213_v60 }
  0xbb   :  { %v222_v1 = vsel %vm219_vm1, %v221_v63, %v217_v0  ;;  %v230_v2 = vmul.f32 %v226_v62, %v122_v61 }
  0xbc   :  { %v227_v4 = vmul.f32 %v222_v1, %v624_v7 }
  0xbd   :  { %283 = vmatmul.f32.gmra.mxu0 %v230_v2 }
  0xbe   :  { %v231_v5 = vmul.f32 %v227_v4, %v145_v3 }
  0xc0   :  { %306 = vmatmul.f32.gmra.mxu1 %v231_v5 }
 0x132   :  { %v281_v8 = vpop.f32.mrf.mxu0 }
 0x133   :  { %v304_v9 = vpop.f32.mrf.mxu1 }
 0x134   :  { %v305_v10 = vadd.f32 %v304_v9, %v281_v8 }
 0x136   :  { %310 = vst.msk [vmem:[#allocation2] sm:$0xff] %vm49_vm0, %v305_v10 }
 0x13a   :  { %v284_v6 = vpop.f32.mrf.mxu0 }
 0x13d   :  { %v307_v11 = vpop.f32.mrf.mxu1 }
 0x13e   :  { %v308_v12 = vadd.f32 %v307_v11, %v284_v6 }
 0x140   :  { %311 = vst.msk [vmem:[#allocation2 + $0x8] sm:$0xff] %vm49_vm0, %v308_v12 }
 0x141   :  { %324 = dma.vmem_to_hbm [thread:$0]  %s317_s30, 256, %s319_s6, [#allocation3], %s388_s7, %s388_s7, %s389_s8  }
 0x142   :  { %385 = dma.done.wait [#allocation3], 256  }
 0x143   :  { %386 = vsyncadd [#allocation3], 4294967040 }
 0x144   :  { %329 = vsyncpa [#allocation3], 1 }

</bundles_post_ra>
